<compile_context>
chip_gen: v7x
topology: tpu7x:2x2x1
jax: 0.10.0
libtpu: 0.0.40
codegen_flags: <defaults>
</compile_context>

<pallas_src>
import jax
import jax.numpy as jnp
from jax import lax
from jax.experimental import pallas as pl
from jax.experimental.pallas import tpu as pltpu


def _round_up(x, m):
    return (x + m - 1) // m * m


def _gather_vmem_kernel(ids_ref, mul_ref, w_ref, out_ref):
    """Fast path: whole table resident in VMEM; gather via dynamic vector loads."""
    # ids_ref : (Npad,)          int32  SMEM (scalar prefetch)
    # mul_ref : (T//C, C, 1)            per-token multiplier tile
    # w_ref   : (V, Dp)                 full embedding table, resident in VMEM
    # out_ref : (T//C, C, Dp)           output tile
    i = pl.program_id(0)
    n_chunks, C, _ = out_ref.shape
    base = i * (n_chunks * C)

    def chunk_body(c, carry):
        # C single-row dynamic loads -> one (C, Dp) sublane-group chunk.
        rows = [w_ref[pl.ds(ids_ref[base + c * C + k], 1), :] for k in range(C)]
        tile = jnp.concatenate(rows, axis=0)                     # (C, Dp)
        out_ref[c] = (tile * mul_ref[c]).astype(out_ref.dtype)   # leading-axis store
        return carry

    lax.fori_loop(0, n_chunks, chunk_body, 0, unroll=2)


def _gather_hbm_kernel(ids_ref, mul_ref, w_hbm, out_ref, rows_ref, sems):
    """Streaming path: per-row HBM DMAs, rolled loops, bounded in-flight window."""
    # ids_ref : (Npad,)          int32  SMEM (scalar prefetch)
    # mul_ref : (T//C, C, 1)            per-token multiplier tile
    # w_hbm   : (V, Dp)                 embedding table, left in HBM (pl.ANY)
    # out_ref : (T//C, C, Dp)           output tile
    # rows_ref: (T//C, C, Dp)    VMEM   gathered-rows scratch
    # sems    : (n_slots,)       DMA    one semaphore slot per in-flight chunk
    i = pl.program_id(0)
    n_chunks, C, _ = rows_ref.shape
    n_slots = sems.shape[0]
    base = i * (n_chunks * C)

    def chunk_copies(c, slot):
        # Scalar (SMEM) reads happen while building the list, i.e. before any wait.
        rows = [ids_ref[base + c * C + k] for k in range(C)]
        return [
            pltpu.make_async_copy(
                w_hbm.at[pl.ds(rows[k], 1), :],
                rows_ref.at[c, pl.ds(k, 1), :],
                sems.at[slot],
            )
            for k in range(C)
        ]

    def issue_chunk(c, slot):
        for cp in chunk_copies(c, slot):
            cp.start()

    def drain_chunk(c, slot):
        # Per-row waits with the exact same (1, Dp) descriptors that were started:
        # correct under either byte- or count-based semaphore accounting, and only
        # chunk c's copies ever signal this slot while we wait on it.
        for cp in chunk_copies(c, slot):
            cp.wait()

    # Prime the window (static, at most n_slots chunks = one sublane group each).
    for s in range(min(n_slots, n_chunks)):
        issue_chunk(s, s)

    def chunk_body(c, carry):
        slot = c % n_slots
        drain_chunk(c, slot)                 # retire exactly chunk c's copies

        @pl.when(c + n_slots < n_chunks)
        def _():
            issue_chunk(c + n_slots, slot)   # keep the window full (slot just freed)

        # Multiply + store of chunk c overlaps the still-in-flight copies.
        out_ref[c] = (rows_ref[c] * mul_ref[c]).astype(out_ref.dtype)
        return carry

    lax.fori_loop(0, n_chunks, chunk_body, 0)


def embedding_dropout(words, weight, *, dropout=0.1, scale=None, rng_key=None,
                      tokens_per_tile=None, vmem_table_bytes_max=8 * 1024 * 1024,
                      mul_dtype=None, window_chunks=4):
    """Forward pass of EmbeddingDropout.

    words : [B, S] integer token ids (contract: 0 <= id < V; ids are clamped for DMA
            safety -- torch.nn.Embedding would raise on out-of-range ids).
    weight: [V, D] embedding table.
    Returns [B, S, D] in weight.dtype.
    """
    B, S = words.shape
    V, D = weight.shape
    N = B * S
    w_dtype = weight.dtype

    # ---- host-side prep: fold dropout mask + scale into one per-token multiplier ----
    if dropout:
        if rng_key is None:
            raise ValueError("rng_key is required when dropout > 0")
        keep = jax.random.bernoulli(rng_key, 1.0 - dropout, (V, 1))
        row_mul = keep.astype(jnp.float32) / jnp.float32(1.0 - dropout)
    else:
        row_mul = jnp.ones((V, 1), jnp.float32)
    if scale is not None:
        row_mul = row_mul * jnp.float32(scale)
    if mul_dtype is None:
        # bf16 multiply halves VALU/vst work on v6e/v7x; pass jnp.float32 on v5e.
        mul_dtype = jnp.bfloat16 if w_dtype == jnp.bfloat16 else jnp.float32
    row_mul = row_mul.astype(mul_dtype)

    # ---- layout: pad D to a lane multiple, pick the sublane chunk C from the dtype ----
    Dp = _round_up(D, 128)
    w_pad = weight if Dp == D else jnp.pad(weight, ((0, 0), (0, Dp - D)))
    w_item = jnp.dtype(w_dtype).itemsize
    mul_item = jnp.dtype(mul_dtype).itemsize
    C = {4: 8, 2: 16, 1: 32}.get(w_item, 8)          # sublane multiple for weight dtype

    table_bytes = V * Dp * w_item
    resident = table_bytes <= vmem_table_bytes_max

    # ---- tokens per grid step: fill a VMEM budget (amortizes ~0.35us/step overhead) ----
    if tokens_per_tile is None:
        budget = 12 * 1024 * 1024                     # rows scratch + 2x out tile + mul
        per_tok = 3 * Dp * w_item + 2 * mul_item
        T = max(C, min(1024, (budget // per_tok) // C * C))
    else:
        assert tokens_per_tile % C == 0, f"tokens_per_tile must be a multiple of {C}"
        T = tokens_per_tile
    T = min(T, _round_up(N, C))
    n_tiles = pl.cdiv(N, T)
    Npad = n_tiles * T

    # ---- token ids (SMEM scalar prefetch) and per-token multiplier tiles ----
    flat_ids = jnp.clip(words.reshape(N).astype(jnp.int32), 0, V - 1)
    if Npad != N:
        flat_ids = jnp.pad(flat_ids, (0, Npad - N))   # padded ids gather row 0; sliced off
    tok_mul = row_mul[flat_ids].reshape(Npad // C, C, 1)

    mul_spec = pl.BlockSpec((T // C, C, 1), lambda i, ids: (i, 0, 0))
    out_spec = pl.BlockSpec((T // C, C, Dp), lambda i, ids: (i, 0, 0))
    out_shape = jax.ShapeDtypeStruct((Npad // C, C, Dp), w_dtype)

    out_tile_bytes = T * Dp * w_item
    mul_tile_bytes = T * mul_item
    if resident:
        kernel = _gather_vmem_kernel
        w_spec = pl.BlockSpec((V, Dp), lambda i, ids: (0, 0))    # whole table, resident
        scratch = []
        vmem_need = 2 * table_bytes + 2 * out_tile_bytes + 2 * mul_tile_bytes
    else:
        kernel = _gather_hbm_kernel
        w_spec = pl.BlockSpec(memory_space=pl.ANY)               # weight stays in HBM
        scratch = [pltpu.VMEM((T // C, C, Dp), w_dtype),         # gathered rows
                   pltpu.SemaphoreType.DMA((window_chunks,))]    # 1 sem / in-flight chunk
        vmem_need = 3 * out_tile_bytes + 2 * mul_tile_bytes
    vmem_limit = int(min(max(vmem_need + (2 << 20), 8 << 20), 48 << 20))

    out3 = pl.pallas_call(
        kernel,
        out_shape=out_shape,
        grid_spec=pltpu.PrefetchScalarGridSpec(
            num_scalar_prefetch=1,                               # flat_ids -> SMEM
            grid=(n_tiles,),
            in_specs=[mul_spec, w_spec],
            out_specs=out_spec,
            scratch_shapes=scratch,
        ),
        compiler_params=pltpu.CompilerParams(
            # Every grid step is self-contained (no cross-step scratch carry), so the
            # token-tile axis may shard across TensorCores on v7x.
            dimension_semantics=("parallel",),
            vmem_limit_bytes=vmem_limit,
        ),
    )(flat_ids, tok_mul, w_pad)

    return out3.reshape(Npad, Dp)[:N, :D].reshape(B, S, D)


if __name__ == "__main__":
    key = jax.random.PRNGKey(0)
    k_w, k_ids, k_mask = jax.random.split(key, 3)

    B, S = 2, 8          # batch x seq -> 16 tokens
    V, D = 64, 128       # small vocab, lane-aligned embedding dim

    weight = jax.random.normal(k_w, (V, D), dtype=jnp.float32)
    words = jax.random.randint(k_ids, (B, S), minval=0, maxval=V, dtype=jnp.int32)
    dropout, scale = 0.1, 2.0

    # Pure-JAX reference (same mask key -> identical bernoulli draw).
    keep = jax.random.bernoulli(k_mask, 1.0 - dropout, (V, 1)).astype(jnp.float32)
    ref = ((keep / (1.0 - dropout)) * weight * scale)[words]

    # 1) Default dispatch: 64x128 table (32 KiB) -> VMEM-resident fast path.
    out = embedding_dropout(words, weight, dropout=dropout, scale=scale, rng_key=k_mask)
    out = jax.block_until_ready(out)
    assert out.shape == (B, S, D), out.shape
    assert jnp.allclose(out, ref, atol=1e-5, rtol=1e-5), float(jnp.max(jnp.abs(out - ref)))

    # 2) Force the HBM streaming path on the same inputs (exercises the windowed DMA gather).
    out2 = embedding_dropout(words, weight, dropout=dropout, scale=scale, rng_key=k_mask,
                             vmem_table_bytes_max=0)
    out2 = jax.block_until_ready(out2)
    assert jnp.allclose(out2, ref, atol=1e-5, rtol=1e-5), float(jnp.max(jnp.abs(out2 - ref)))

    print("KERNEL_OK")
</pallas_src>

<mosaic_0001>
module attributes {stable_mosaic.version = 11 : i64} {
  func.func @_gather_vmem_kernel(%arg0: i32, %arg1: memref<16xi32, #tpu.memory_space<smem>>, %arg2: memref<2x8x1xf32, #tpu.memory_space<vmem>>, %arg3: memref<64x128xf32, #tpu.memory_space<vmem>>, %arg4: memref<2x8x128xf32, #tpu.memory_space<vmem>>) attributes {dimension_semantics = [#tpu.dimension_semantics<parallel>], iteration_bounds = array<i64: 1>, scalar_prefetch = 1 : i64, scratch_operands = 0 : i64, tpu.core_type = #tpu.core_type<tc>, window_params = [{transform_indices = @transform_0, window_bounds = array<i64: 2, 8, 1>}, {pipeline_mode = #tpu.pipeline_mode<synchronous>, transform_indices = @transform_1, window_bounds = array<i64: 64, 128>}, {transform_indices = @transform_2, window_bounds = array<i64: 2, 8, 128>}]} {
    %c16_i32 = arith.constant 16 : i32
    %0 = arith.muli %arg0, %c16_i32 : i32
    %c0_i32 = arith.constant 0 : i32
    %c8_i32 = arith.constant 8 : i32
    %1 = arith.muli %c0_i32, %c8_i32 : i32
    %2 = arith.addi %0, %1 : i32
    %c0_i32_0 = arith.constant 0 : i32
    %3 = arith.addi %2, %c0_i32_0 : i32
    %4 = arith.index_cast %3 : i32 to index
    %5 = memref.load %arg1[%4] : memref<16xi32, #tpu.memory_space<smem>>
    %6 = arith.index_cast %5 : i32 to index
    %c0 = arith.constant 0 : index
    %7 = vector.load %arg3[%6, %c0] : memref<64x128xf32, #tpu.memory_space<vmem>>, vector<1x128xf32>
    %c8_i32_1 = arith.constant 8 : i32
    %8 = arith.muli %c0_i32, %c8_i32_1 : i32
    %9 = arith.addi %0, %8 : i32
    %c1_i32 = arith.constant 1 : i32
    %10 = arith.addi %9, %c1_i32 : i32
    %11 = arith.index_cast %10 : i32 to index
    %12 = memref.load %arg1[%11] : memref<16xi32, #tpu.memory_space<smem>>
    %13 = arith.index_cast %12 : i32 to index
    %c0_2 = arith.constant 0 : index
    %14 = vector.load %arg3[%13, %c0_2] : memref<64x128xf32, #tpu.memory_space<vmem>>, vector<1x128xf32>
    %c8_i32_3 = arith.constant 8 : i32
    %15 = arith.muli %c0_i32, %c8_i32_3 : i32
    %16 = arith.addi %0, %15 : i32
    %c2_i32 = arith.constant 2 : i32
    %17 = arith.addi %16, %c2_i32 : i32
    %18 = arith.index_cast %17 : i32 to index
    %19 = memref.load %arg1[%18] : memref<16xi32, #tpu.memory_space<smem>>
    %20 = arith.index_cast %19 : i32 to index
    %c0_4 = arith.constant 0 : index
    %21 = vector.load %arg3[%20, %c0_4] : memref<64x128xf32, #tpu.memory_space<vmem>>, vector<1x128xf32>
    %c8_i32_5 = arith.constant 8 : i32
    %22 = arith.muli %c0_i32, %c8_i32_5 : i32
    %23 = arith.addi %0, %22 : i32
    %c3_i32 = arith.constant 3 : i32
    %24 = arith.addi %23, %c3_i32 : i32
    %25 = arith.index_cast %24 : i32 to index
    %26 = memref.load %arg1[%25] : memref<16xi32, #tpu.memory_space<smem>>
    %27 = arith.index_cast %26 : i32 to index
    %c0_6 = arith.constant 0 : index
    %28 = vector.load %arg3[%27, %c0_6] : memref<64x128xf32, #tpu.memory_space<vmem>>, vector<1x128xf32>
    %c8_i32_7 = arith.constant 8 : i32
    %29 = arith.muli %c0_i32, %c8_i32_7 : i32
    %30 = arith.addi %0, %29 : i32
    %c4_i32 = arith.constant 4 : i32
    %31 = arith.addi %30, %c4_i32 : i32
    %32 = arith.index_cast %31 : i32 to index
    %33 = memref.load %arg1[%32] : memref<16xi32, #tpu.memory_space<smem>>
    %34 = arith.index_cast %33 : i32 to index
    %c0_8 = arith.constant 0 : index
    %35 = vector.load %arg3[%34, %c0_8] : memref<64x128xf32, #tpu.memory_space<vmem>>, vector<1x128xf32>
    %c8_i32_9 = arith.constant 8 : i32
    %36 = arith.muli %c0_i32, %c8_i32_9 : i32
    %37 = arith.addi %0, %36 : i32
    %c5_i32 = arith.constant 5 : i32
    %38 = arith.addi %37, %c5_i32 : i32
    %39 = arith.index_cast %38 : i32 to index
    %40 = memref.load %arg1[%39] : memref<16xi32, #tpu.memory_space<smem>>
    %41 = arith.index_cast %40 : i32 to index
    %c0_10 = arith.constant 0 : index
    %42 = vector.load %arg3[%41, %c0_10] : memref<64x128xf32, #tpu.memory_space<vmem>>, vector<1x128xf32>
    %c8_i32_11 = arith.constant 8 : i32
    %43 = arith.muli %c0_i32, %c8_i32_11 : i32
    %44 = arith.addi %0, %43 : i32
    %c6_i32 = arith.constant 6 : i32
    %45 = arith.addi %44, %c6_i32 : i32
    %46 = arith.index_cast %45 : i32 to index
    %47 = memref.load %arg1[%46] : memref<16xi32, #tpu.memory_space<smem>>
    %48 = arith.index_cast %47 : i32 to index
    %c0_12 = arith.constant 0 : index
    %49 = vector.load %arg3[%48, %c0_12] : memref<64x128xf32, #tpu.memory_space<vmem>>, vector<1x128xf32>
    %c8_i32_13 = arith.constant 8 : i32
    %50 = arith.muli %c0_i32, %c8_i32_13 : i32
    %51 = arith.addi %0, %50 : i32
    %c7_i32 = arith.constant 7 : i32
    %52 = arith.addi %51, %c7_i32 : i32
    %53 = arith.index_cast %52 : i32 to index
    %54 = memref.load %arg1[%53] : memref<16xi32, #tpu.memory_space<smem>>
    %55 = arith.index_cast %54 : i32 to index
    %c0_14 = arith.constant 0 : index
    %56 = vector.load %arg3[%55, %c0_14] : memref<64x128xf32, #tpu.memory_space<vmem>>, vector<1x128xf32>
    %57 = tpu.concatenate %7, %14, %21, %28, %35, %42, %49, %56 in 0 : vector<1x128xf32>, vector<1x128xf32>, vector<1x128xf32>, vector<1x128xf32>, vector<1x128xf32>, vector<1x128xf32>, vector<1x128xf32>, vector<1x128xf32> -> vector<8x128xf32>
    %58 = arith.index_cast %c0_i32 : i32 to index
    %c0_15 = arith.constant 0 : index
    %c0_16 = arith.constant 0 : index
    %59 = vector.load %arg2[%58, %c0_15, %c0_16] : memref<2x8x1xf32, #tpu.memory_space<vmem>>, vector<1x8x1xf32>
    %60 = vector.shape_cast %59 : vector<1x8x1xf32> to vector<8x1xf32>
    %61 = vector.broadcast %60 : vector<8x1xf32> to vector<8x128xf32>
    %62 = arith.mulf %57, %61 : vector<8x128xf32>
    %63 = arith.index_cast %c0_i32 : i32 to index
    %c0_17 = arith.constant 0 : index
    %c0_18 = arith.constant 0 : index
    %64 = vector.load %arg4[%63, %c0_17, %c0_18] : memref<2x8x128xf32, #tpu.memory_space<vmem>>, vector<1x8x128xf32>
    %65 = vector.shape_cast %64 : vector<1x8x128xf32> to vector<8x128xf32>
    %66 = vector.shape_cast %62 : vector<8x128xf32> to vector<1x8x128xf32>
    tpu.vector_store %arg4[%63, %c0_17, %c0_18], %66 {strides = array<i32>} : memref<2x8x128xf32, #tpu.memory_space<vmem>>, vector<1x8x128xf32>,
    %c1_i32_19 = arith.constant 1 : i32
    %c8_i32_20 = arith.constant 8 : i32
    %67 = arith.muli %c1_i32_19, %c8_i32_20 : i32
    %68 = arith.addi %0, %67 : i32
    %c0_i32_21 = arith.constant 0 : i32
    %69 = arith.addi %68, %c0_i32_21 : i32
    %70 = arith.index_cast %69 : i32 to index
    %71 = memref.load %arg1[%70] : memref<16xi32, #tpu.memory_space<smem>>
    %72 = arith.index_cast %71 : i32 to index
    %c0_22 = arith.constant 0 : index
    %73 = vector.load %arg3[%72, %c0_22] : memref<64x128xf32, #tpu.memory_space<vmem>>, vector<1x128xf32>
    %c8_i32_23 = arith.constant 8 : i32
    %74 = arith.muli %c1_i32_19, %c8_i32_23 : i32
    %75 = arith.addi %0, %74 : i32
    %c1_i32_24 = arith.constant 1 : i32
    %76 = arith.addi %75, %c1_i32_24 : i32
    %77 = arith.index_cast %76 : i32 to index
    %78 = memref.load %arg1[%77] : memref<16xi32, #tpu.memory_space<smem>>
    %79 = arith.index_cast %78 : i32 to index
    %c0_25 = arith.constant 0 : index
    %80 = vector.load %arg3[%79, %c0_25] : memref<64x128xf32, #tpu.memory_space<vmem>>, vector<1x128xf32>
    %c8_i32_26 = arith.constant 8 : i32
    %81 = arith.muli %c1_i32_19, %c8_i32_26 : i32
    %82 = arith.addi %0, %81 : i32
    %c2_i32_27 = arith.constant 2 : i32
    %83 = arith.addi %82, %c2_i32_27 : i32
    %84 = arith.index_cast %83 : i32 to index
    %85 = memref.load %arg1[%84] : memref<16xi32, #tpu.memory_space<smem>>
    %86 = arith.index_cast %85 : i32 to index
    %c0_28 = arith.constant 0 : index
    %87 = vector.load %arg3[%86, %c0_28] : memref<64x128xf32, #tpu.memory_space<vmem>>, vector<1x128xf32>
    %c8_i32_29 = arith.constant 8 : i32
    %88 = arith.muli %c1_i32_19, %c8_i32_29 : i32
    %89 = arith.addi %0, %88 : i32
    %c3_i32_30 = arith.constant 3 : i32
    %90 = arith.addi %89, %c3_i32_30 : i32
    %91 = arith.index_cast %90 : i32 to index
    %92 = memref.load %arg1[%91] : memref<16xi32, #tpu.memory_space<smem>>
    %93 = arith.index_cast %92 : i32 to index
    %c0_31 = arith.constant 0 : index
    %94 = vector.load %arg3[%93, %c0_31] : memref<64x128xf32, #tpu.memory_space<vmem>>, vector<1x128xf32>
    %c8_i32_32 = arith.constant 8 : i32
    %95 = arith.muli %c1_i32_19, %c8_i32_32 : i32
    %96 = arith.addi %0, %95 : i32
    %c4_i32_33 = arith.constant 4 : i32
    %97 = arith.addi %96, %c4_i32_33 : i32
    %98 = arith.index_cast %97 : i32 to index
    %99 = memref.load %arg1[%98] : memref<16xi32, #tpu.memory_space<smem>>
    %100 = arith.index_cast %99 : i32 to index
    %c0_34 = arith.constant 0 : index
    %101 = vector.load %arg3[%100, %c0_34] : memref<64x128xf32, #tpu.memory_space<vmem>>, vector<1x128xf32>
    %c8_i32_35 = arith.constant 8 : i32
    %102 = arith.muli %c1_i32_19, %c8_i32_35 : i32
    %103 = arith.addi %0, %102 : i32
    %c5_i32_36 = arith.constant 5 : i32
    %104 = arith.addi %103, %c5_i32_36 : i32
    %105 = arith.index_cast %104 : i32 to index
    %106 = memref.load %arg1[%105] : memref<16xi32, #tpu.memory_space<smem>>
    %107 = arith.index_cast %106 : i32 to index
    %c0_37 = arith.constant 0 : index
    %108 = vector.load %arg3[%107, %c0_37] : memref<64x128xf32, #tpu.memory_space<vmem>>, vector<1x128xf32>
    %c8_i32_38 = arith.constant 8 : i32
    %109 = arith.muli %c1_i32_19, %c8_i32_38 : i32
    %110 = arith.addi %0, %109 : i32
    %c6_i32_39 = arith.constant 6 : i32
    %111 = arith.addi %110, %c6_i32_39 : i32
    %112 = arith.index_cast %111 : i32 to index
    %113 = memref.load %arg1[%112] : memref<16xi32, #tpu.memory_space<smem>>
    %114 = arith.index_cast %113 : i32 to index
    %c0_40 = arith.constant 0 : index
    %115 = vector.load %arg3[%114, %c0_40] : memref<64x128xf32, #tpu.memory_space<vmem>>, vector<1x128xf32>
    %c8_i32_41 = arith.constant 8 : i32
    %116 = arith.muli %c1_i32_19, %c8_i32_41 : i32
    %117 = arith.addi %0, %116 : i32
    %c7_i32_42 = arith.constant 7 : i32
    %118 = arith.addi %117, %c7_i32_42 : i32
    %119 = arith.index_cast %118 : i32 to index
    %120 = memref.load %arg1[%119] : memref<16xi32, #tpu.memory_space<smem>>
    %121 = arith.index_cast %120 : i32 to index
    %c0_43 = arith.constant 0 : index
    %122 = vector.load %arg3[%121, %c0_43] : memref<64x128xf32, #tpu.memory_space<vmem>>, vector<1x128xf32>
    %123 = tpu.concatenate %73, %80, %87, %94, %101, %108, %115, %122 in 0 : vector<1x128xf32>, vector<1x128xf32>, vector<1x128xf32>, vector<1x128xf32>, vector<1x128xf32>, vector<1x128xf32>, vector<1x128xf32>, vector<1x128xf32> -> vector<8x128xf32>
    %124 = arith.index_cast %c1_i32_19 : i32 to index
    %c0_44 = arith.constant 0 : index
    %c0_45 = arith.constant 0 : index
    %125 = vector.load %arg2[%124, %c0_44, %c0_45] : memref<2x8x1xf32, #tpu.memory_space<vmem>>, vector<1x8x1xf32>
    %126 = vector.shape_cast %125 : vector<1x8x1xf32> to vector<8x1xf32>
    %127 = vector.broadcast %126 : vector<8x1xf32> to vector<8x128xf32>
    %128 = arith.mulf %123, %127 : vector<8x128xf32>
    %129 = arith.index_cast %c1_i32_19 : i32 to index
    %c0_46 = arith.constant 0 : index
    %c0_47 = arith.constant 0 : index
    %130 = vector.load %arg4[%129, %c0_46, %c0_47] : memref<2x8x128xf32, #tpu.memory_space<vmem>>, vector<1x8x128xf32>
    %131 = vector.shape_cast %130 : vector<1x8x128xf32> to vector<8x128xf32>
    %132 = vector.shape_cast %128 : vector<8x128xf32> to vector<1x8x128xf32>
    tpu.vector_store %arg4[%129, %c0_46, %c0_47], %132 {strides = array<i32>} : memref<2x8x128xf32, #tpu.memory_space<vmem>>, vector<1x8x128xf32>,
    %c2_i32_48 = arith.constant 2 : i32
    return
  }
  func.func @transform_0(%arg0: i32, %arg1: memref<16xi32, #tpu.memory_space<smem>>) -> (i32, i32, i32) {
    %c0_i32 = arith.constant 0 : i32
    %c0_i32_0 = arith.constant 0 : i32
    %c0_i32_1 = arith.constant 0 : i32
    return %arg0, %c0_i32, %c0_i32_0 : i32, i32, i32
  }
  func.func @transform_1(%arg0: i32, %arg1: memref<16xi32, #tpu.memory_space<smem>>) -> (i32, i32) {
    %c0_i32 = arith.constant 0 : i32
    %c0_i32_0 = arith.constant 0 : i32
    %c0_i32_1 = arith.constant 0 : i32
    return %c0_i32, %c0_i32_0 : i32, i32
  }
  func.func @transform_2(%arg0: i32, %arg1: memref<16xi32, #tpu.memory_space<smem>>) -> (i32, i32, i32) {
    %c0_i32 = arith.constant 0 : i32
    %c0_i32_0 = arith.constant 0 : i32
    %c0_i32_1 = arith.constant 0 : i32
    return %arg0, %c0_i32, %c0_i32_0 : i32, i32, i32
  }
}

</mosaic_0001>

<bundles_post_ra>
// kernel: tpu_custom_call.1
= control target key start
LH: loop header
LB: loop body
LE: loop exit
PB: predicated region body
PF: predicated region fallthrough
CT: control target
= control target key end

     0   :  { %s398_s0 = inlined_call_operand.vmem [shape: s32[16], index: 0, kind: input, shape index: {}]   ;;  %s399_s1 = inlined_call_operand.vmem [shape: f32[2,8,1], index: 1, kind: input, shape index: {}]   ;;  %s400_s2 = inlined_call_operand.hbm [shape: f32[64,128], index: 2, kind: input, shape index: {}]   ;;  %s401_s3 = inlined_call_operand.hbm [shape: f32[2,8,128], index: 3, kind: output, shape index: {}]  }
   0x1   :  { %s8_s14 = sshll.u32 %s398_s0, 4  ;;  %s9_s14 = int_to_ptr.vmem [resolvable:$true] %s8_s14 }
   0x2   :  { %s234_s15 = scalar_lea.vmem %s9_s14, 16  ;;  %p239_p1 = scmp.lt.s32.totalorder %s9_s14, %s9_s14 }
   0x3   :  { %p235_p0 = scmp.ne.s32.totalorder %s9_s14, %s234_s15  ;;  %p240_p2 = scmp.lt.s32.totalorder %s234_s15, %s234_s15 }
   0x5   :  { %p241_p3 = por %p240_p2, %p239_p1 }
   0x7   :  { %p242_p4 = pnand %p241_p3, %p235_p0 }
   0x9   :  { %245 = shalt.err (!%p242_p4)  }
   0xa   :  { %s296_s16 = smov [#allocation3]  }
   0xb   :  { %11 = dma.vmem_to_smem %s9_s14, 16, %s296_s16, [#allocation2] }
   0xc   :  { %290 = dma.done.wait [#allocation2], 16 }
   0xd   :  { %291 = vsyncadd [#allocation2], 4294967280 }
   0xe   :  { %13 = sfence }
   0xf   :  { %14 = vsyncpa [#allocation5], 0 }
  0x10   :  { %15 = vsyncpa [#allocation6], 0  ;;  %s297_s17 = smov [#allocation4]   ;;  %s246_s20 = scalar_lea.hbm %s400_s2, 1024 }
  0x11   :  { %s23_s18 = sshll.u32 %s297_s17, 4  ;;  %p247_p5 = scmp.ne.s32.totalorder %s400_s2, %s246_s20  ;;  %s24_s18 = int_to_ptr.vmem [resolvable:$true] %s23_s18 }
  0x12   :  { %p250_p6 = scmp.lt.u32.totalorder %s246_s20, %s400_s2 }
  0x14   :  { %p252_p7 = pnand %p250_p6, %p247_p5 }
  0x16   :  { %255 = shalt.err (!%p252_p7)
}
  0x17   :  { %s256_s25 = scalar_lea.vmem %s24_s18, 1024  ;;  %p261_p9 = scmp.lt.s32.totalorder %s24_s18, %s24_s18 }
  0x18   :  { %p257_p8 = scmp.ne.s32.totalorder %s24_s18, %s256_s25  ;;  %p262_p10 = scmp.lt.s32.totalorder %s256_s25, %s256_s25 }
  0x1a   :  { %p263_p11 = por %p262_p10, %p261_p9 }
  0x1c   :  { %p264_p12 = pnand %p263_p11, %p257_p8 }
  0x1e   :  { %267 = shalt.err (!%p264_p12)
}
  0x1f   :  { %s298_s26 = smov 128   ;;  %s299_s27 = smov 8  }
  0x20   :  { %29 = dma.hbm_to_vmem [thread:$0]  %s400_s2, 1024, %s24_s18, [#allocation5], %s298_s26, %s298_s26, %s299_s27  }
  0x21   :  { %292 = dma.done.wait [#allocation5], 1024  }
  0x22   :  { %293 = vsyncadd [#allocation5], 4294966272  ;;  %v300_v0 = vmov 0   ;;  %v100_v1 = vld [vmem:[%s399_s1] sm:$0xff]  ;;  %v226_v2 = vld [vmem:[%s399_s1 + $0x8] sm:$0xff]  ;;  %s211_s7 = sld [smem:[#allocation3 + $0x1]] }
  0x23   :  { %233 = vset.pattern.permute.xlu0 %v300_v0  ;;  %s212_s8 = sld [smem:[#allocation3 + $0x2]]  ;;  %s34_s9 = sld [smem:[#allocation3]]  ;;  %vm86_vm0 = vcmask 1040384   ;;  %vm88_vm1 = vcmask 1041408   ;;  %vm90_vm2 = vcmask 1042432   ;;  %vm92_vm3 = vcmask 1043456  }
  0x24   :  { %103 = vperm.xlu0 %233, %v100_v1   ;;  %s219_s10 = sld [smem:[#allocation3 + $0x9]]  ;;  %s213_s11 = sld [smem:[#allocation3 + $0x3]]  ;;  %vm94_vm4 = vcmask 1044480   ;;  %vm96_vm5 = vcmask 1045504   ;;  %vm98_vm6 = vcmask 1046528  }
  0x25   :  { %s220_s2 = sld [smem:[#allocation3 + $0xa]]  ;;  %s218_s12 = sld [smem:[#allocation3 + $0x8]] }
  0x26   :  { %s346_s13 = sld [smem:[#allocation3 + $0x4]]  ;;  %s348_s14 = sld [smem:[#allocation3 + $0xb]] }
  0x27   :  { %s350_s16 = sld [smem:[#allocation3 + $0x5]]  ;;  %s352_s17 = sld [smem:[#allocation3 + $0xc]] }
  0x28   :  { %172 = vperm.xlu0 %233, %v226_v2   ;;  %s39_s15 = scalar_lea.vmem [#allocation4], %s211_s7  ;;  %s354_s1 = sld [smem:[#allocation3 + $0x6]] }
  0x29   :  { %v40_v3 = vld [vmem:[%s39_s15] sm:$0x1]  ;;  %s43_s18 = scalar_lea.vmem [#allocation4], %s212_s8  ;;  %s35_s19 = scalar_lea.vmem [#allocation4], %s34_s9 }
  0x2a   :  { %v44_v4 = vld [vmem:[%s43_s18] sm:$0x1]  ;;  %v66_v5 = vrot.slane %v40_v3, 7  ;;  %s114_s0 = scalar_lea.vmem [#allocation4], %s219_s10  ;;  %s356_s20 = sld [smem:[#allocation3 + $0xd]] }
  0x2b   :  { %v36_v6 = vld [vmem:[%s35_s19] sm:$0x1]  ;;  %s47_s21 = scalar_lea.vmem [#allocation4], %s213_s11  ;;  %v69_v9 = vrot.slane %v44_v4, 6  ;;  %s358_s22 = sld [smem:[#allocation3 + $0x7]] }
  0x2c   :  { %v115_v7 = vld [vmem:[%s114_s0] sm:$0x1]  ;;  %v87_v10 = vsel %vm86_vm0, %v36_v6, %v66_v5  ;;  %s118_s23 = scalar_lea.vmem [#allocation4], %s220_s2  ;;  %s110_s24 = scalar_lea.vmem [#allocation4], %s218_s12 }
  0x2d   :  { %v48_v8 = vld [vmem:[%s47_s21] sm:$0x1]  ;;  %v141_v12 = vrot.slane %v115_v7, 7  ;;  %s361_s25 = sld [smem:[#allocation3 + $0xe]]  ;;  %s51_s28 = scalar_lea.vmem [#allocation4], %s346_s13  ;;  %v89_v16 = vsel %vm88_vm1, %v87_v10, %v69_v9 }
  0x2e   :  { %v119_v11 = vld [vmem:[%s118_s23] sm:$0x1]  ;;  %v72_v15 = vrot.slane %v48_v8, 5  ;;  %s122_s29 = scalar_lea.vmem [#allocation4], %s348_s14  ;;  %s366_s30 = sld [smem:[#allocation3 + $0xf]] }
  0x2f   :  { %v111_v13 = vld [vmem:[%s110_s24] sm:$0x1]  ;;  %v144_v18 = vrot.slane %v119_v11, 6  ;;  %s55_s4 = scalar_lea.vmem [#allocation4], %s350_s16  ;;  %s126_s5 = scalar_lea.vmem [#allocation4], %s352_s17 }
  0x30   :  { %v52_v14 = vld [vmem:[%s51_s28] sm:$0x1]  ;;  %v161_v19 = vsel %vm86_vm0, %v111_v13, %v141_v12  ;;  %v91_v22 = vsel %vm90_vm2, %v89_v16, %v72_v15  ;;  %s59_s6 = scalar_lea.vmem [#allocation4], %s354_s1  ;;  %s130_s7 = scalar_lea.vmem [#allocation4], %s356_s20 }
  0x31   :  { %v123_v17 = vld [vmem:[%s122_s29] sm:$0x1]  ;;  %v75_v21 = vrot.slane %v52_v14, 4  ;;  %v162_v25 = vsel %vm88_vm1, %v161_v19, %v144_v18  ;;  %s63_s8 = scalar_lea.vmem [#allocation4], %s358_s22  ;;  %s301_s11 = smov [#allocation7]  }
  0x32   :  { %v56_v20 = vld [vmem:[%s55_s4] sm:$0x1]  ;;  %v147_v24 = vrot.slane %v123_v17, 5  ;;  %s183_s2 = sshll.u32 %s301_s11, 4  ;;  %s184_s2 = int_to_ptr.vmem [resolvable:$true] %s183_s2 }
  0x33   :  { %v127_v23 = vld [vmem:[%s126_s5] sm:$0x1]  ;;  %v78_v27 = vrot.slane %v56_v20, 3  ;;  %v93_v28 = vsel %vm92_vm3, %v91_v22, %v75_v21  ;;  %s134_s9 = scalar_lea.vmem [#allocation4], %s361_s25  ;;  %s268_s12 = scalar_lea.vmem %s184_s2, 256 }
  0x34   :  { %v60_v26 = vld [vmem:[%s59_s6] sm:$0x1]  ;;  %v150_v30 = vrot.slane %v127_v23, 4  ;;  %v163_v31 = vsel %vm90_vm2, %v162_v25, %v147_v24  ;;  %s138_s10 = scalar_lea.vmem [#allocation4], %s366_s30  ;;  %p269_p13 = scmp.ne.s32.totalorder %s184_s2, %s268_s12 }
  0x35   :  { %v131_v29 = vld [vmem:[%s130_s7] sm:$0x1]  ;;  %v81_v33 = vrot.slane %v60_v26, 2  ;;  %v95_v34 = vsel %vm94_vm4, %v93_v28, %v78_v27  ;;  %p273_p0 = scmp.lt.s32.totalorder %s184_s2, %s184_s2  ;;  %p274_p1 = scmp.lt.s32.totalorder %s268_s12, %s268_s12 }
  0x36   :  { %v64_v32 = vld [vmem:[%s63_s8] sm:$0x1]  ;;  %v153_v36 = vrot.slane %v131_v29, 3  ;;  %v164_v37 = vsel %vm92_vm3, %v163_v31, %v150_v30 }
  0x37   :  { %v135_v35 = vld [vmem:[%s134_s9] sm:$0x1]  ;;  %v84_v38 = vrot.slane %v64_v32, 1  ;;  %v97_v39 = vsel %vm96_vm5, %v95_v34, %v81_v33  ;;  %p275_p2 = por %p274_p1, %p273_p0 }
  0x38   :  { %v139_v40 = vld [vmem:[%s138_s10] sm:$0x1]  ;;  %v156_v41 = vrot.slane %v135_v35, 2  ;;  %v165_v42 = vsel %vm94_vm4, %v164_v37, %v153_v36 }
  0x39   :  { %v99_v43 = vsel %vm98_vm6, %v97_v39, %v84_v38  ;;  %v159_v44 = vrot.slane %v139_v40, 1  ;;  %p276_p3 = pnand %p275_p2, %p269_p13 }
  0x3a   :  { %v166_v45 = vsel %vm96_vm5, %v165_v42, %v156_v41 }
  0x3b   :  { %v167_v48 = vsel %vm98_vm6, %v166_v45, %v159_v44 }
  0xa3   :  { %v104_v46 = vpop.permute.xlu0 %103 }
  0xa4   :  { %v106_v47 = vmul.f32 %v104_v46, %v99_v43 }
  0xa6   :  { %107 = vst [vmem:[#allocation7] sm:$0xff] %v106_v47 }
  0xa7   :  { %v173_v49 = vpop.permute.xlu0 %172 }
  0xa8   :  { %v175_v50 = vmul.f32 %v173_v49, %v167_v48 }
  0xaa   :  { %177 = vst [vmem:[#allocation7 + $0x8] sm:$0xff] %v175_v50 }
  0xab   :  { %279 = shalt.err (!%p276_p3)
}
  0xac   :  { %s280_s15 = scalar_lea.hbm %s401_s3, 256 }
  0xad   :  { %p281_p4 = scmp.ne.s32.totalorder %s401_s3, %s280_s15  ;;  %p284_p5 = scmp.lt.u32.totalorder %s280_s15, %s401_s3 }
  0xaf   :  { %p286_p6 = pnand %p284_p5, %p281_p4 }
  0xb1   :  { %289 = shalt.err (!%p286_p6)
}
  0xb2   :  { %189 = dma.vmem_to_hbm [thread:$0]  %s184_s2, 256, %s401_s3, [#allocation6], %s298_s26, %s298_s26, %s299_s27  }
  0xb3   :  { %294 = dma.done.wait [#allocation6], 256  }
  0xb4   :  { %295 = vsyncadd [#allocation6], 4294967040 }
  0xb5   :  { %193 = vsyncpa [#allocation5], 1 }
  0xb6   :  { %194 = vsyncpa [#allocation6], 1 }

</bundles_post_ra>
